<compile_context>
chip_gen: v7x
topology: tpu7x:2x2x1
jax: 0.10.0
libtpu: 0.0.40
codegen_flags: <defaults>
</compile_context>

<pallas_src>
import numpy as np
import jax
import jax.numpy as jnp
from jax.experimental import pallas as pl
from jax.experimental.pallas import tpu as pltpu

# ----- model hyper-parameters (small, consistent with the module) -----------
T = 32            # time samples per trial ("num_features" axis)
C = 16            # EEG electrodes (channel_num)
K = 5             # graph convolution kernel count
KW = 8            # temporal conv width: Conv2d(1, 1, kernel_size=(1, 8))
TP = T - KW + 1   # = 25 valid temporal-conv outputs
TPPAD = 32        # TP padded to a sublane-friendly 32 (pad rows are exact zeros)
KC = K * C        # = 80 graph-conv feature lanes
H1 = 8            # fc hidden width
EPS = 1e-5

GB = 8            # trials processed per grid step
NB = 32           # total demo trials (batch); must be a multiple of GB


# ---------------------------------------------------------------------------
# Fused kernel (one grid step = GB trials):
#   graph conv (K kernels concatenated, lane-dense)
#   -> BN1-folded temporal conv as a block-diagonal Toeplitz matmul (+ masked bias)
#   -> ReLU
#   -> [BN2 + 1/TP + FC1] folded into one matmul
#   -> per-trial time sum (XLU sublane reduce) + Tanh
#   -> FC2 + Softmax on VPU/XLU/EUP.
# ---------------------------------------------------------------------------
def make_tgcn_kernel(b2_0, b2_1):
    R_CONV = GB * TPPAD        # rows of wconv / biasmat               (= 256)
    R_ADJ = R_CONV             # adjcat rows start in the bf16 slab
    R_W1 = R_CONV + 16         # w1pad rows start in the bf16 slab

    def kernel(x_ref, wb_ref, wf_ref, out_ref):
        # --- constant weights (VMEM-resident across the trial grid) ---------
        wconv = wb_ref[0:R_CONV, :]                 # (GB*TPPAD, GB*T) bf16 Toeplitz
        adjcat = wb_ref[R_ADJ:R_ADJ + C, 0:128]     # (C, 128) bf16, lanes 80..127 = 0
        w1pad = wb_ref[R_W1:R_W1 + 128, 0:128]      # (128, 128) bf16, BN2 & 1/TP folded
        biasmat = wf_ref[0:R_CONV, :]               # (GB*TPPAD, 128) f32 masked conv bias
        tail = wf_ref[R_CONV:R_CONV + 16, :]        # (16, 128) f32: b1 row + w2 rows
        b1row = tail[0:1, :]                        # (1, 128)
        w2r0 = tail[8:9, :]                         # (1, 128)
        w2r1 = tail[9:10, :]                        # (1, 128)

        # --- per-step data ---------------------------------------------------
        xb = x_ref[...].astype(jnp.bfloat16)        # (GB*T, C)

        # Graph conv first (keeps intermediates 80/128 lanes wide).
        g = jnp.dot(xb, adjcat,
                    preferred_element_type=jnp.float32)            # (GB*T, 128)

        # BN1-folded temporal conv = block-diagonal Toeplitz matmul; the conv
        # bias (pushed through the graph conv) is added only on real rows via
        # the precomputed masked bias matrix, so pad rows stay exactly zero.
        y = jnp.dot(wconv, g.astype(jnp.bfloat16),
                    preferred_element_type=jnp.float32) + biasmat  # (GB*TPPAD, 128)
        m = jnp.maximum(y, 0.0)                                    # ReLU

        # FC1 with BN2 (eval) and the 1/TP time-mean folded in; applied before
        # the time reduction (both are linear), so M stays large for the MXU.
        proj = jnp.dot(m.astype(jnp.bfloat16), w1pad,
                       preferred_element_type=jnp.float32)         # (GB*TPPAD, 128)

        # Per-trial sum over the TPPAD time rows (7 pad rows are exact zeros).
        gsum = jnp.sum(proj.reshape(GB, TPPAD, 128), axis=1)       # (GB, 128)
        h = jnp.tanh(gsum + b1row)                                 # (GB, 128); lanes 8.. = 0

        # FC2 + softmax entirely off the MXU (VPU multiply + XLU lane reduce).
        logit0 = jnp.sum(h * w2r0, axis=-1, keepdims=True) + b2_0  # (GB, 1)
        logit1 = jnp.sum(h * w2r1, axis=-1, keepdims=True) + b2_1  # (GB, 1)
        mx = jnp.maximum(logit0, logit1)
        e0 = jnp.exp(logit0 - mx)
        e1 = jnp.exp(logit1 - mx)
        inv = pl.reciprocal(e0 + e1, approx=False)   # exact: probs sum to 1
        p0 = e0 * inv
        p1 = e1 * inv

        # Lane-dense (GB, 128) output block; wrapper slices the 2 live lanes.
        col = jax.lax.broadcasted_iota(jnp.int32, (GB, 128), 1)
        out_ref[...] = jnp.where(col == 0, p0, jnp.where(col == 1, p1, 0.0))

    return kernel


# ---------------------------------------------------------------------------
# Deterministic parameter construction (mirrors the module __init__ shapes)
# plus the init-time folding / slab packing used by the fused kernel.
# ---------------------------------------------------------------------------
def init_params():
    rng = np.random.RandomState(0)

    # --- MyGraphConvolution graph kernel (built at module-init time) --------
    # TODO(synk): edges{C}.npy is external data; use a deterministic ring graph.
    edges = [(i, (i + 1) % C) for i in range(C)]
    adjacency = np.zeros((C, C))
    for a, b in edges:
        adjacency[a, b] = 1.0
        adjacency[b, a] = 1.0
    adjacency = np.sign(adjacency + np.eye(C))
    laplacian = np.sum(adjacency, axis=0) * np.eye(C) - adjacency
    _, e_vets = np.linalg.eigh(laplacian)        # symmetric -> eigh (reproducible)
    e_vets = np.real(e_vets).astype(np.float32)
    std = np.sqrt(2.0 / (C + K * C))             # xavier_normal on (K, 1, C)
    gk = rng.normal(0.0, std, size=(K, 1, C)).astype(np.float32)
    gk = gk * np.eye(C, dtype=np.float32)        # (K, C, C) diagonal
    graph_kernel = e_vets @ gk @ e_vets.T        # (K, C, C) = A_k
    adjT = np.transpose(graph_kernel, (0, 2, 1)).astype(np.float32)      # adjT[k,c,d]=A_k[d,c]
    adjcat = np.transpose(adjT, (1, 0, 2)).reshape(C, KC).astype(np.float32)

    # --- Tconv: Conv2d(1, 1, (1, 8)) -----------------------------------------
    bound = 1.0 / np.sqrt(KW)
    conv_w = rng.uniform(-bound, bound, size=(KW,)).astype(np.float32)
    conv_b = np.float32(rng.uniform(-bound, bound))

    # --- BatchNorm layers: eval mode, default running stats / affine ---------
    bn1_scale = np.float32(1.0 / np.sqrt(1.0 + EPS))
    bn1_shift = np.float32(0.0)
    bn2_scale = np.full((K,), 1.0 / np.sqrt(1.0 + EPS), np.float32)
    bn2_shift = np.zeros((K,), np.float32)

    # --- fc head: Linear(K*C, 8) -> Tanh -> Linear(8, 2) -> Softmax ----------
    lim1 = 1.0 / np.sqrt(KC)
    w1 = rng.uniform(-lim1, lim1, size=(H1, KC)).astype(np.float32)
    b1 = rng.uniform(-lim1, lim1, size=(H1,)).astype(np.float32)
    lim2 = 1.0 / np.sqrt(H1)
    w2 = rng.uniform(-lim2, lim2, size=(2, H1)).astype(np.float32)
    b2 = rng.uniform(-lim2, lim2, size=(2,)).astype(np.float32)

    # ======= init-time folding for the fused kernel ==========================
    # BN1 + temporal conv as a block-diagonal Toeplitz over GB trials; the TP
    # real output rows per trial are padded to TPPAD all-zero rows.
    wconv = np.zeros((GB * TPPAD, GB * T), np.float32)
    for s in range(GB):
        for tp in range(TP):
            for k in range(KW):
                wconv[s * TPPAD + tp, s * T + tp + k] = conv_w[k] * bn1_scale
    ybias = float(bn1_shift) * float(conv_w.sum()) + float(conv_b)

    # Conv bias pushed through the (reordered) graph conv: per-lane bias row,
    # masked to real rows so pad rows stay exactly zero before the ReLU.
    colsum = adjcat.sum(axis=0)                               # (KC,)
    biasrow = np.zeros((128,), np.float32)
    biasrow[:KC] = ybias * colsum
    rowmask = np.zeros((GB * TPPAD, 1), np.float32)
    for s in range(GB):
        rowmask[s * TPPAD:s * TPPAD + TP, 0] = 1.0
    biasmat = rowmask * biasrow[None, :]                      # (GB*TPPAD, 128)

    # BN2 (eval affine) and the 1/TP time-mean commute with FC1 -> fold in.
    w1_kc_o = np.ascontiguousarray(w1.T).reshape(K, C, H1)    # [k, c, o]
    w1_eff = (w1_kc_o * (bn2_scale[:, None, None] / TP)).reshape(KC, H1)
    b1_eff = b1 + (bn2_shift[:, None] * w1_kc_o.sum(axis=1)).sum(axis=0)
    w1pad = np.zeros((128, 128), np.float32)
    w1pad[:KC, :H1] = w1_eff

    # --- pack constants into two lane-aligned slabs (3 input DMAs total) -----
    # bf16 slab (MXU operands): [ wconv | adjcat | w1pad ], width = GB*T = 256.
    wbf = np.zeros((GB * TPPAD + 16 + 128, GB * T), np.float32)
    wbf[0:GB * TPPAD, :] = wconv
    wbf[GB * TPPAD:GB * TPPAD + C, 0:KC] = adjcat
    wbf[GB * TPPAD + 16:GB * TPPAD + 16 + 128, 0:128] = w1pad
    # f32 slab (VPU operands): [ biasmat | b1 row, w2 rows ], width 128.
    wf = np.zeros((GB * TPPAD + 16, 128), np.float32)
    wf[0:GB * TPPAD, :] = biasmat
    wf[GB * TPPAD, :H1] = b1_eff
    wf[GB * TPPAD + 8, :H1] = w2[0, :]
    wf[GB * TPPAD + 9, :H1] = w2[1, :]

    kernel_params = dict(
        wbf=jnp.asarray(wbf).astype(jnp.bfloat16),
        wf32=jnp.asarray(wf),
        b2_0=float(b2[0]),
        b2_1=float(b2[1]),
    )
    raw_params = dict(
        bn1_scale=jnp.float32(bn1_scale), bn1_shift=jnp.float32(bn1_shift),
        conv_w=jnp.asarray(conv_w), conv_b=jnp.float32(conv_b),
        adjT=jnp.asarray(adjT),
        bn2_scale=jnp.asarray(bn2_scale), bn2_shift=jnp.asarray(bn2_shift),
        w1=jnp.asarray(w1), b1=jnp.asarray(b1),
        w2=jnp.asarray(w2), b2=jnp.asarray(b2),
    )
    return kernel_params, raw_params


# ---------------------------------------------------------------------------
# Forward wrapper: 1-D trial grid, weights resident, x/out blocks advance.
# ---------------------------------------------------------------------------
def tgcn_forward(data, params):
    # data: (NB, T, C) float32 == the PyTorch `data` argument (batched trials).
    nb = data.shape[0]
    assert nb % GB == 0 and data.shape[1] == T and data.shape[2] == C
    x_flat = data.reshape(nb * T, C)

    kernel = make_tgcn_kernel(params["b2_0"], params["b2_1"])
    out = pl.pallas_call(
        kernel,
        out_shape=jax.ShapeDtypeStruct((nb, 128), jnp.float32),
        grid=(nb // GB,),
        in_specs=[
            pl.BlockSpec((GB * T, C), lambda i: (i, 0)),        # x: advances per step
            pl.BlockSpec(params["wbf"].shape, lambda i: (0, 0)),   # bf16 slab: resident
            pl.BlockSpec(params["wf32"].shape, lambda i: (0, 0)),  # f32 slab: resident
        ],
        out_specs=pl.BlockSpec((GB, 128), lambda i: (i, 0)),    # lane-dense output block
        compiler_params=pltpu.CompilerParams(
            dimension_semantics=("parallel",)),                 # v7x: 2 TCs share trials
    )(x_flat, params["wbf"], params["wf32"])

    probs = out[:, :2]                                          # live lanes
    cha = jnp.ones((64,), jnp.float32)   # matches `cha = torch.ones(64)` branch
    return probs, cha


# Pure-JAX reference built from the UNFOLDED parameters (checks the folding).
def tgcn_reference(data, raw):
    x = data * raw["bn1_scale"] + raw["bn1_shift"]                       # BN1 (eval)
    y = sum(raw["conv_w"][k] * x[:, k:k + TP, :]
            for k in range(KW)) + raw["conv_b"]                          # Tconv
    m = jnp.einsum("btc,kcd->bktd", y, raw["adjT"])                      # graph conv
    m = jnp.maximum(m, 0.0)                                              # ReLU
    m = (m * raw["bn2_scale"][None, :, None, None]
         + raw["bn2_shift"][None, :, None, None])                        # BN2 (eval)
    feat = jnp.mean(m, axis=2).reshape(data.shape[0], KC)                # mean_t + flatten
    h = jnp.tanh(feat @ raw["w1"].T + raw["b1"])                         # FC1 + Tanh
    logits = h @ raw["w2"].T + raw["b2"]                                 # FC2
    return jax.nn.softmax(logits, axis=-1)                               # Softmax(dim=1)


if __name__ == "__main__":
    kparams, rawparams = init_params()
    key = jax.random.PRNGKey(0)
    data = jax.random.normal(key, (NB, T, C), dtype=jnp.float32)

    probs, cha = tgcn_forward(data, kparams)
    probs = jax.block_until_ready(probs)
    cha = jax.block_until_ready(cha)

    assert probs.shape == (NB, 2) and cha.shape == (64,)
    ref = tgcn_reference(data, rawparams)
    # bf16 MXU operands with f32 accumulation -> small, bounded deviation.
    np.testing.assert_allclose(np.asarray(probs), np.asarray(ref),
                               rtol=2e-3, atol=2e-3)
    print("KERNEL_OK")
</pallas_src>

<mosaic_0001>
module attributes {stable_mosaic.version = 11 : i64} {
  func.func @kernel(%arg0: i32, %arg1: memref<256x16xf32, #tpu.memory_space<vmem>>, %arg2: memref<400x256xbf16, #tpu.memory_space<vmem>>, %arg3: memref<272x128xf32, #tpu.memory_space<vmem>>, %arg4: memref<8x128xf32, #tpu.memory_space<vmem>>) attributes {dimension_semantics = [#tpu.dimension_semantics<parallel>], iteration_bounds = array<i64: 4>, scalar_prefetch = 0 : i64, scratch_operands = 0 : i64, tpu.core_type = #tpu.core_type<tc>, window_params = [{transform_indices = @transform_0, window_bounds = array<i64: 256, 16>}, {pipeline_mode = #tpu.pipeline_mode<synchronous>, transform_indices = @transform_1, window_bounds = array<i64: 400, 256>}, {pipeline_mode = #tpu.pipeline_mode<synchronous>, transform_indices = @transform_2, window_bounds = array<i64: 272, 128>}, {transform_indices = @transform_3, window_bounds = array<i64: 8, 128>}]} {
    %c0 = arith.constant 0 : index
    %c0_0 = arith.constant 0 : index
    %0 = vector.load %arg2[%c0, %c0_0] : memref<400x256xbf16, #tpu.memory_space<vmem>>, vector<256x256xbf16>
    %c256 = arith.constant 256 : index
    %c0_1 = arith.constant 0 : index
    %1 = vector.load %arg2[%c256, %c0_1] : memref<400x256xbf16, #tpu.memory_space<vmem>>, vector<16x128xbf16>
    %c272 = arith.constant 272 : index
    %c0_2 = arith.constant 0 : index
    %2 = vector.load %arg2[%c272, %c0_2] : memref<400x256xbf16, #tpu.memory_space<vmem>>, vector<128x128xbf16>
    %c0_3 = arith.constant 0 : index
    %c0_4 = arith.constant 0 : index
    %3 = vector.load %arg3[%c0_3, %c0_4] : memref<272x128xf32, #tpu.memory_space<vmem>>, vector<256x128xf32>
    %c256_5 = arith.constant 256 : index
    %c0_6 = arith.constant 0 : index
    %4 = vector.load %arg3[%c256_5, %c0_6] : memref<272x128xf32, #tpu.memory_space<vmem>>, vector<16x128xf32>
    %5 = vector.extract_strided_slice %4 {offsets = [0, 0], sizes = [1, 128], strides = [1, 1]} : vector<16x128xf32> to vector<1x128xf32>
    %6 = vector.extract_strided_slice %4 {offsets = [8, 0], sizes = [1, 128], strides = [1, 1]} : vector<16x128xf32> to vector<1x128xf32>
    %7 = vector.extract_strided_slice %4 {offsets = [9, 0], sizes = [1, 128], strides = [1, 1]} : vector<16x128xf32> to vector<1x128xf32>
    %c0_7 = arith.constant 0 : index
    %c0_8 = arith.constant 0 : index
    %8 = vector.load %arg1[%c0_7, %c0_8] : memref<256x16xf32, #tpu.memory_space<vmem>>, vector<256x16xf32>
    %9 = arith.truncf %8 : vector<256x16xf32> to vector<256x16xbf16>
    %cst = arith.constant dense<0.000000e+00> : vector<256x128xf32>
    %10 = tpu.matmul %9, %1, %cst {dimension_numbers = #tpu.dot_dimension_numbers<[1], [0], [0], [1], [0, 0, 1, 1], [], []>} : vector<256x16xbf16>, vector<16x128xbf16>, vector<256x128xf32> -> vector<256x128xf32>
    %11 = arith.truncf %10 : vector<256x128xf32> to vector<256x128xbf16>
    %cst_9 = arith.constant dense<0.000000e+00> : vector<256x128xf32>
    %12 = tpu.matmul %0, %11, %cst_9 {dimension_numbers = #tpu.dot_dimension_numbers<[1], [0], [0], [1], [0, 0, 1, 1], [], []>} : vector<256x256xbf16>, vector<256x128xbf16>, vector<256x128xf32> -> vector<256x128xf32>
    %13 = arith.addf %12, %3 : vector<256x128xf32>
    %cst_10 = arith.constant 0.000000e+00 : f32
    %14 = vector.broadcast %cst_10 : f32 to vector<256x128xf32>
    %15 = arith.maximumf %13, %14 : vector<256x128xf32>
    %16 = arith.truncf %15 : vector<256x128xf32> to vector<256x128xbf16>
    %cst_11 = arith.constant dense<0.000000e+00> : vector<256x128xf32>
    %17 = tpu.matmul %16, %2, %cst_11 {dimension_numbers = #tpu.dot_dimension_numbers<[1], [0], [0], [1], [0, 0, 1, 1], [], []>} : vector<256x128xbf16>, vector<128x128xbf16>, vector<256x128xf32> -> vector<256x128xf32>
    %18 = vector.shape_cast %17 : vector<256x128xf32> to vector<8x32x128xf32>
    %cst_12 = arith.constant dense<0.000000e+00> : vector<8x128xf32>
    %19 = vector.multi_reduction <add>, %18, %cst_12 [1] : vector<8x32x128xf32> to vector<8x128xf32>
    %20 = vector.broadcast %5 : vector<1x128xf32> to vector<8x128xf32>
    %21 = arith.addf %19, %20 : vector<8x128xf32>
    %22 = math.tanh %21 : vector<8x128xf32>
    %23 = vector.broadcast %6 : vector<1x128xf32> to vector<8x128xf32>
    %24 = arith.mulf %22, %23 : vector<8x128xf32>
    %cst_13 = arith.constant dense<0.000000e+00> : vector<8xf32>
    %25 = vector.multi_reduction <add>, %24, %cst_13 [1] : vector<8x128xf32> to vector<8xf32>
    %26 = vector.shape_cast %25 : vector<8xf32> to vector<8x1xf32>
    %cst_14 = arith.constant -0.180390373 : f32
    %27 = vector.broadcast %cst_14 : f32 to vector<8x1xf32>
    %28 = arith.addf %26, %27 : vector<8x1xf32>
    %29 = vector.broadcast %7 : vector<1x128xf32> to vector<8x128xf32>
    %30 = arith.mulf %22, %29 : vector<8x128xf32>
    %cst_15 = arith.constant dense<0.000000e+00> : vector<8xf32>
    %31 = vector.multi_reduction <add>, %30, %cst_15 [1] : vector<8x128xf32> to vector<8xf32>
    %32 = vector.shape_cast %31 : vector<8xf32> to vector<8x1xf32>
    %cst_16 = arith.constant -0.20049499 : f32
    %33 = vector.broadcast %cst_16 : f32 to vector<8x1xf32>
    %34 = arith.addf %32, %33 : vector<8x1xf32>
    %35 = arith.maximumf %28, %34 : vector<8x1xf32>
    %36 = arith.subf %28, %35 : vector<8x1xf32>
    %37 = math.exp %36 : vector<8x1xf32>
    %38 = arith.subf %34, %35 : vector<8x1xf32>
    %39 = math.exp %38 : vector<8x1xf32>
    %40 = arith.addf %37, %39 : vector<8x1xf32>
    %41 = tpu.reciprocal %40 : vector<8x1xf32> -> vector<8x1xf32>
    %42 = arith.mulf %37, %41 : vector<8x1xf32>
    %43 = arith.mulf %39, %41 : vector<8x1xf32>
    %44 = tpu.iota {dimensions = array<i32: 1>} : vector<8x128xi32>
    %c0_i32 = arith.constant 0 : i32
    %45 = vector.broadcast %c0_i32 : i32 to vector<8x128xi32>
    %46 = arith.cmpi eq, %44, %45 : vector<8x128xi32>
    %c1_i32 = arith.constant 1 : i32
    %47 = vector.broadcast %c1_i32 : i32 to vector<8x128xi32>
    %48 = arith.cmpi eq, %44, %47 : vector<8x128xi32>
    %cst_17 = arith.constant 0.000000e+00 : f32
    %49 = vector.shape_cast %43 : vector<8x1xf32> to vector<8x1xf32>
    %50 = vector.broadcast %49 : vector<8x1xf32> to vector<8x128xf32>
    %51 = vector.broadcast %cst_17 : f32 to vector<8x128xf32>
    %52 = arith.select %48, %50, %51 : vector<8x128xi1>, vector<8x128xf32>
    %53 = vector.shape_cast %42 : vector<8x1xf32> to vector<8x1xf32>
    %54 = vector.broadcast %53 : vector<8x1xf32> to vector<8x128xf32>
    %55 = arith.select %46, %54, %52 : vector<8x128xi1>, vector<8x128xf32>
    %c0_18 = arith.constant 0 : index
    %c0_19 = arith.constant 0 : index
    %56 = vector.load %arg4[%c0_18, %c0_19] : memref<8x128xf32, #tpu.memory_space<vmem>>, vector<8x128xf32>
    tpu.vector_store %arg4[%c0_18, %c0_19], %55 {strides = array<i32>} : memref<8x128xf32, #tpu.memory_space<vmem>>, vector<8x128xf32>,
    return
  }
  func.func @transform_0(%arg0: i32) -> (i32, i32) {
    %c0_i32 = arith.constant 0 : i32
    %c0_i32_0 = arith.constant 0 : i32
    return %arg0, %c0_i32 : i32, i32
  }
  func.func @transform_1(%arg0: i32) -> (i32, i32) {
    %c0_i32 = arith.constant 0 : i32
    %c0_i32_0 = arith.constant 0 : i32
    %c0_i32_1 = arith.constant 0 : i32
    return %c0_i32, %c0_i32_0 : i32, i32
  }
  func.func @transform_2(%arg0: i32) -> (i32, i32) {
    %c0_i32 = arith.constant 0 : i32
    %c0_i32_0 = arith.constant 0 : i32
    %c0_i32_1 = arith.constant 0 : i32
    return %c0_i32, %c0_i32_0 : i32, i32
  }
  func.func @transform_3(%arg0: i32) -> (i32, i32) {
    %c0_i32 = arith.constant 0 : i32
    %c0_i32_0 = arith.constant 0 : i32
    return %arg0, %c0_i32 : i32, i32
  }
}

</mosaic_0001>

<bundles_post_ra>
// kernel: tpu_custom_call.1
= control target key start
LH: loop header
LB: loop body
LE: loop exit
PB: predicated region body
PF: predicated region fallthrough
CT: control target
= control target key end

     0   :  { %8 = vsyncpa [#allocation3], 0  ;;  %s2292_s0 = inlined_call_operand.vmem [shape: f32[1024,16], index: 0, kind: input, shape index: {}]   ;;  %s2293_s1 = inlined_call_operand.vmem [shape: bf16[400,256], index: 1, kind: input, shape index: {}]   ;;  %s2294_s2 = inlined_call_operand.vmem [shape: f32[272,128], index: 2, kind: input, shape index: {}]   ;;  %s2295_s3 = inlined_call_operand.hbm [shape: f32[32,128], index: 3, kind: output, shape index: {}]  }
   0x1   :  { %10 = vsyncpa [#allocation3 + $0x1], 0  ;;  %s1886_s12 = smov 0   ;;  %s1888_s13 = smov 0  }
   0x2   :  { %s1890_s14 = smov 0   ;;  %s1892_s15 = smov 0  }
   0x3 LB: > { %s1907_s16 = sadd.s32 4294967295, %s1863_s15   ;;  %s1380_s17 = sadd.s32 4294967294, %s1863_s15   ;;  %s1863_s15 = sphi %s1892_s15, %s2301_s15   ;;  %s1859_s14 = sphi %s1890_s14, %s2300_s14   ;;  %s1855_s13 = sphi %s1888_s13, %s2299_s13   ;;  %s1851_s12 = sphi %s1886_s12, %s2298_s12  }
   0x4   : > { %s1911_s18 = sadd.s32 1, %s1863_s15   ;;  %s91_s19 = sadd.s32 1, %s1859_s14 }
   0x5   : > { %s88_s20 = ssub.s32 %s1863_s15, %s1911_s18  ;;  %p101_p0 = scmp.ne.s32.totalorder %s1859_s14, %s1855_s13 }
   0x6   : > { %p89_p1 = scmp.eq.s32.totalorder %s88_s20, 0  ;;  %p102_p2 = scmp.eq.s32.totalorder %s1907_s16, 3 }
   0x7   : > { %p107_p3 = scmp.ne.s32.totalorder %s1855_s13, %s1851_s12  ;;  %p108_p4 = scmp.eq.s32.totalorder %s1380_s17, 3 }
   0x8   : > { %s1922_s21 = scalar_select %p89_p1, %s1859_s14, %s91_s19  }
   0x9   : > { %p1924_p5 = por %p102_p2, %p101_p0  ;;  %p1928_p6 = por %p108_p4, %p107_p3 }
   0xa   : > { %p1383_p7 = scmp.ge.s32.totalorder %s1863_s15, 1  ;;  %p141_p8 = scmp.lt.s32.totalorder %s1863_s15, 5 }
   0xc   : > { %p142_p9 = pnand %p1383_p7, %p141_p8 }
   0xd   : > { %v1722_v0 = vld [vmem:[%s2293_s1 + $0x100] ss:$8 sps:$4 sm:$0xff] (!%p142_p9)   ;;  %s1385_s26 = sshll.u32 (!%p142_p9), %s1907_s16, 5  ;;  %vm310_vm0 = vcmask (!%p142_p9), 130048   ;;  %v1725_v49 = vld [vmem:[%s2293_s1 + $0x4] ss:$8 sps:$4 sm:$0xff] (!%p142_p9)  }
   0xe   : > { %145 = sbr.rel (%p142_p9) target bundleno = 1100 (0x44c), region = 32  ;;  %1601 = vmatprep.subr.bf16.mxu0 (!%p142_p9), %v1722_v0  ;;  %p166_p10 = scmp.lt.s32.totalorder (!%p142_p9), %s1385_s26, 127  ;;  %728 = vmatprep.mubr.bf16.mxu1 (!%p142_p9), %v1725_v49  ;;  %v1743_v49 = vld [vmem:[%s2293_s1 + $0x60] ss:$8 sps:$4 sm:$0xff] (!%p142_p9)   ;;  %vm1227_vm1 = vcmask (!%p142_p9), 1041409   ;;  %vm1230_vm2 = vcmask (!%p142_p9), 1042434  }
   0xf   : > { %1602 = vmatpush3.bf16.msra.mxu0 (!%p142_p9), %v1722_v0  ;;  %vm1233_vm3 = vcmask (!%p142_p9), 1043459   ;;  %vm1236_vm4 = vcmask (!%p142_p9), 1044484   ;;  %vm1239_vm5 = vcmask (!%p142_p9), 1045509   ;;  %vm1242_vm6 = vcmask (!%p142_p9), 1046534   ;;  %s162_s8 = sand.u32 (!%p142_p9), 1, %s1855_s13   ;;  %s1445_s10 = sshll.u32 (!%p142_p9), %s1907_s16, 7 }
  0x10   : > { %vm1245_vm7 = vcmask (!%p142_p9), 1047559   ;;  %s1384_s9 = sshll.u32 (!%p142_p9), %s162_s8, 3  ;;  %s2250_s24 = scalar_lea.hbm (!%p142_p9), %s2295_s3, %s1445_s10 }
  0x11   : > { %s164_s11 = scalar_lea.vmem (!%p142_p9), [#allocation2], %s1384_s9  ;;  %s1308_s25 = scalar_lea.sflag (!%p142_p9), [#allocation3], %s162_s8 }
  0x12   : > { %s1321_s17 = sshll.u32 (!%p142_p9), %s164_s11, 4  ;;  %s2252_s17 = int_to_ptr.vmem [resolvable:$true] %s1321_s17 }
  0x13   : > { %s1801_s16 = scalar_lea.vmem (!%p142_p9), %s2252_s17, 128 }
  0x14   : > { %p1802_p11 = scmp.ne.s32.totalorder (!%p142_p9), %s2252_s17, %s1801_s16 }
  0x15   : > { %s2303_s26 = smov (!%p166_p10, %s1385_s26), 127 }
  0x16   : > { %s1386_s27 = sshll.u32 %s2303_s26, 3  ;;  %p1803_p12 = pnand %p1802_p11, %p1924_p5 }
  0x17   : > { %s1941_s30 = scalar_lea.vmem %s2292_s0, %s1386_s27  ;;  %s1865_s26 = smov [#allocation2]  }
  0x18   : > { %v256_v1 = vld [vmem:[%s1941_s30] sm:$0xff]  ;;  %v257_v2 = vld [vmem:[%s1941_s30 + $0x8] sm:$0xff]  ;;  %v258_v3 = vld [vmem:[%s1941_s30 + $0x10] sm:$0xff]  ;;  %p1804_p13 = pneg %p1803_p12  ;;  %s1805_s27 = sshll.u32 %s1865_s26, 4  ;;  %s1806_s27 = int_to_ptr.vmem [resolvable:$false] %s1805_s27 }
  0x19   : > { %v288_v4 = vpack.c.bf16 %v257_v2, %v256_v1  ;;  %v259_v5 = vld [vmem:[%s1941_s30 + $0x18] sm:$0xff]  ;;  %v260_v6 = vld [vmem:[%s1941_s30 + $0x20] sm:$0xff]  ;;  %v261_v7 = vld [vmem:[%s1941_s30 + $0x28] sm:$0xff]  ;;  %s1807_s28 = scalar_lea.vmem %s1806_s27, 256  ;;  %p1808_p0 = scmp.lt.s32.totalorder %s2252_s17, %s1806_s27 }
  0x1a   : > { %v289_v8 = vpack.c.bf16 %v259_v5, %v258_v3  ;;  %v290_v9 = vpack.c.bf16 %v261_v7, %v260_v6  ;;  %v262_v10 = vld [vmem:[%s1941_s30 + $0x30] sm:$0xff]  ;;  %v263_v11 = vld [vmem:[%s1941_s30 + $0x38] sm:$0xff]  ;;  %v264_v12 = vld [vmem:[%s1941_s30 + $0x40] sm:$0xff]  ;;  %p1809_p1 = scmp.lt.s32.totalorder %s1807_s28, %s1801_s16 }
  0x1b   : > { %1603 = vmatprep.mubr.msk.bf16.mxu0 %vm310_vm0, %v288_v4  ;;  %v265_v13 = vld [vmem:[%s1941_s30 + $0x48] sm:$0xff]  ;;  %v291_v14 = vpack.c.bf16 %v263_v11, %v262_v10  ;;  %v266_v16 = vld [vmem:[%s1941_s30 + $0x50] sm:$0xff]  ;;  %v267_v17 = vld [vmem:[%s1941_s30 + $0x58] sm:$0xff] }
  0x1c   : > { %1604 = vmatmul.mubr.msk.bf16.vlgmr.msra.gmra.mrb[0].mxu0 %vm310_vm0, %v289_v8  ;;  %v292_v15 = vpack.c.bf16 %v265_v13, %v264_v12  ;;  %v268_v18 = vld [vmem:[%s1941_s30 + $0x60] sm:$0xff]  ;;  %v269_v19 = vld [vmem:[%s1941_s30 + $0x68] sm:$0xff]  ;;  %v293_v20 = vpack.c.bf16 %v267_v17, %v266_v16  ;;  %v270_v22 = vld [vmem:[%s1941_s30 + $0x70] sm:$0xff]  ;;  %p1810_p2 = por %p1809_p1, %p1808_p0 }
  0x1d   : > { %1607 = vmatprep.mubr.msk.bf16.mxu0 %vm310_vm0, %v290_v9  ;;  %v294_v21 = vpack.c.bf16 %v269_v19, %v268_v18  ;;  %v271_v23 = vld [vmem:[%s1941_s30 + $0x78] sm:$0xff]  ;;  %v272_v24 = vld [vmem:[%s1941_s30 + $0x80] sm:$0xff]  ;;  %v273_v25 = vld [vmem:[%s1941_s30 + $0x88] sm:$0xff] }
  0x1e   : > { %v295_v26 = vpack.c.bf16 %v271_v23, %v270_v22  ;;  %v296_v27 = vpack.c.bf16 %v273_v25, %v272_v24  ;;  %v274_v28 = vld [vmem:[%s1941_s30 + $0x90] sm:$0xff]  ;;  %v275_v29 = vld [vmem:[%s1941_s30 + $0x98] sm:$0xff]  ;;  %v276_v30 = vld [vmem:[%s1941_s30 + $0xa0] sm:$0xff]  ;;  %p1811_p3 = pnand %p1810_p2, %p1804_p13 }
  0x1f   : > { %v277_v31 = vld [vmem:[%s1941_s30 + $0xa8] sm:$0xff]  ;;  %v297_v32 = vpack.c.bf16 %v275_v29, %v274_v28  ;;  %v278_v34 = vld [vmem:[%s1941_s30 + $0xb0] sm:$0xff]  ;;  %v279_v35 = vld [vmem:[%s1941_s30 + $0xb8] sm:$0xff] }
  0x20   : > { %v298_v33 = vpack.c.bf16 %v277_v31, %v276_v30  ;;  %v280_v36 = vld [vmem:[%s1941_s30 + $0xc0] sm:$0xff]  ;;  %v281_v37 = vld [vmem:[%s1941_s30 + $0xc8] sm:$0xff]  ;;  %v299_v38 = vpack.c.bf16 %v279_v35, %v278_v34  ;;  %v282_v40 = vld [vmem:[%s1941_s30 + $0xd0] sm:$0xff] }
  0x21   : > { %v300_v39 = vpack.c.bf16 %v281_v37, %v280_v36  ;;  %v283_v41 = vld [vmem:[%s1941_s30 + $0xd8] sm:$0xff]  ;;  %v284_v42 = vld [vmem:[%s1941_s30 + $0xe0] sm:$0xff]  ;;  %v285_v43 = vld [vmem:[%s1941_s30 + $0xe8] sm:$0xff] }
  0x22   : > { %v301_v44 = vpack.c.bf16 %v283_v41, %v282_v40  ;;  %v302_v45 = vpack.c.bf16 %v285_v43, %v284_v42  ;;  %v286_v46 = vld [vmem:[%s1941_s30 + $0xf0] sm:$0xff]  ;;  %v287_v47 = vld [vmem:[%s1941_s30 + $0xf8] sm:$0xff]  ;;  %v1772_v35 = vld [vmem:[%s2293_s1 + $0x120] ss:$8 sps:$4 sm:$0xff]  }
  0x23   : > { %v303_v48 = vpack.c.bf16 %v287_v47, %v286_v46  ;;  %v1771_v34 = vld [vmem:[%s2293_s1 + $0x110] ss:$8 sps:$4 sm:$0xff]   ;;  %v1723_v36 = vld [vmem:[%s2293_s1] ss:$8 sps:$4 sm:$0xff]   ;;  %v1729_v40 = vld [vmem:[%s2293_s1 + $0x24] ss:$8 sps:$4 sm:$0xff]  }
  0x24   : > { %1608 = vmatmul.mubr.msk.bf16.gmra.mrb[4].mxu0 %vm310_vm0, %v291_v14  ;;  %1635 = vmatprep.subr.bf16.mxu0 %v1771_v34  ;;  %v1773_v37 = vld [vmem:[%s2293_s1 + $0x130] ss:$8 sps:$4 sm:$0xff]   ;;  %v1731_v41 = vld [vmem:[%s2293_s1 + $0x20] ss:$8 sps:$4 sm:$0xff]   ;;  %v1732_v42 = vld [vmem:[%s2293_s1 + $0x34] ss:$8 sps:$4 sm:$0xff]  }
  0x25   : > { %1611 = vmatprep.mubr.msk.bf16.mxu0 %vm310_vm0, %v292_v15  ;;  %1636 = vmatpush3.bf16.msra.mxu0 %v1771_v34  ;;  %v1734_v43 = vld [vmem:[%s2293_s1 + $0x30] ss:$8 sps:$4 sm:$0xff]   ;;  %v1738_v46 = vld [vmem:[%s2293_s1 + $0x54] ss:$8 sps:$4 sm:$0xff]  }
  0x26   : > { %1637 = vmatprep.subr.bf16.mxu0 %v1772_v35  ;;  %v1740_v47 = vld [vmem:[%s2293_s1 + $0x50] ss:$8 sps:$4 sm:$0xff]  }
  0x29   : > { %1638 = vmatpush3.bf16.msra.mxu0 %v1772_v35  ;;  %v226_v35 = vld [vmem:[%s2294_s2 + $0x20] sm:$0xff] }
  0x2a   : > { %1639 = vmatprep.subr.bf16.mxu0 %v1773_v37 }
  0x2c   : > { %1612 = vmatmul.mubr.msk.bf16.gmra.mrb[8].mxu0 %vm310_vm0, %v293_v20 }
  0x2d   : > { %1615 = vmatprep.mubr.msk.bf16.mxu0 %vm310_vm0, %v294_v21  ;;  %1640 = vmatpush3.bf16.msra.mxu0 %v1773_v37 }
  0x34   : > { %1616 = vmatmul.mubr.msk.bf16.gmra.mrb[12].mxu0 %vm310_vm0, %v295_v26 }
  0x35   : > { %1619 = vmatprep.mubr.msk.bf16.mxu0 %vm310_vm0, %v296_v27 }
  0x3c   : > { %1620 = vmatmul.mubr.msk.bf16.gmra.mrb[16].mxu0 %vm310_vm0, %v297_v32 }
  0x3d   : > { %1623 = vmatprep.mubr.msk.bf16.mxu0 %vm310_vm0, %v298_v33 }
  0x44   : > { %1624 = vmatmul.mubr.msk.bf16.gmra.mrb[20].mxu0 %vm310_vm0, %v299_v38  ;;  %v1726_v38 = vld [vmem:[%s2293_s1 + $0x14] ss:$8 sps:$4 sm:$0xff]  }
  0x45   : > { %1627 = vmatprep.mubr.msk.bf16.mxu0 %vm310_vm0, %v300_v39  ;;  %v1728_v39 = vld [vmem:[%s2293_s1 + $0x10] ss:$8 sps:$4 sm:$0xff]  }
  0x4c   : > { %1628 = vmatmul.mubr.msk.bf16.gmra.mrb[24].mxu0 %vm310_vm0, %v301_v44  ;;  %v1735_v44 = vld [vmem:[%s2293_s1 + $0x44] ss:$8 sps:$4 sm:$0xff]  }
  0x4d   : > { %1631 = vmatprep.mubr.msk.bf16.mxu0 %vm310_vm0, %v302_v45  ;;  %v1737_v45 = vld [vmem:[%s2293_s1 + $0x40] ss:$8 sps:$4 sm:$0xff]  }
  0x54   : > { %1632 = vmatmul.mubr.msk.bf16.gmra.mrb[28].mxu0 %vm310_vm0, %v303_v48  ;;  %v1741_v48 = vld [vmem:[%s2293_s1 + $0x64] ss:$8 sps:$4 sm:$0xff]  }
  0xef   : > { %v1605_v50 = vpop.f32.mrb[0].mxu0 }
  0xf0   : > { %v393_v51 = vpop.f32.mrb[1].mxu0 }
  0xf1   : > { %v1606_v52 = vpop.f32.mrb[2].mxu0 }
  0xf2   : > { %v521_v53 = vpack.c.bf16 %v1606_v52, %v1605_v50  ;;  %v396_v54 = vpop.f32.mrb[3].mxu0  ;;  %v1744_v50 = vld [vmem:[%s2293_s1 + $0x74] ss:$8 sps:$4 sm:$0xff]   ;;  %v1747_v52 = vld [vmem:[%s2293_s1 + $0x84] ss:$8 sps:$4 sm:$0xff]  }
  0xf3   : > { %v520_v55 = vpack.c.bf16 %v396_v54, %v393_v51  ;;  %v1746_v51 = vld [vmem:[%s2293_s1 + $0x70] ss:$8 sps:$4 sm:$0xff]   ;;  %v1750_v54 = vld [vmem:[%s2293_s1 + $0x94] ss:$8 sps:$4 sm:$0xff]  }
  0xf7   : > { %v1609_v56 = vpop.f32.mrb[4].mxu0 }
  0xf8   : > { %v409_v57 = vpop.f32.mrb[5].mxu0 }
  0xf9   : > { %v1610_v58 = vpop.f32.mrb[6].mxu0 }
  0xfa   : > { %v523_v59 = vpack.c.bf16 %v1610_v58, %v1609_v56  ;;  %v412_v60 = vpop.f32.mrb[7].mxu0  ;;  %v1753_v56 = vld [vmem:[%s2293_s1 + $0xa4] ss:$8 sps:$4 sm:$0xff]   ;;  %v1756_v58 = vld [vmem:[%s2293_s1 + $0xb4] ss:$8 sps:$4 sm:$0xff]  }
  0xfb   : > { %v522_v61 = vpack.c.bf16 %v412_v60, %v409_v57  ;;  %v1755_v57 = vld [vmem:[%s2293_s1 + $0xa0] ss:$8 sps:$4 sm:$0xff]   ;;  %v1758_v60 = vld [vmem:[%s2293_s1 + $0xb0] ss:$8 sps:$4 sm:$0xff]  }
  0xff   : > { %v1613_v62 = vpop.f32.mrb[8].mxu0 }
 0x100   : > { %v425_v63 = vpop.f32.mrb[9].mxu0 }
 0x101   : > { %v1614_v0 = vpop.f32.mrb[10].mxu0 }
 0x102   : > { %v525_v1 = vpack.c.bf16 %v1614_v0, %v1613_v62  ;;  %v428_v2 = vpop.f32.mrb[11].mxu0  ;;  %v1775_v62 = vld [vmem:[%s2293_s1 + $0x150] ss:$8 sps:$4 sm:$0xff]   ;;  %v1761_v0 = vld [vmem:[%s2293_s1 + $0xc0] ss:$8 sps:$4 sm:$0xff]  }
 0x103   : > { %v524_v3 = vpack.c.bf16 %v428_v2, %v425_v63  ;;  %v1776_v63 = vld [vmem:[%s2293_s1 + $0x160] ss:$8 sps:$4 sm:$0xff]   ;;  %v1777_v2 = vld [vmem:[%s2293_s1 + $0x170] ss:$8 sps:$4 sm:$0xff]  }
 0x107   : > { %v1617_v4 = vpop.f32.mrb[12].mxu0 }
 0x108   : > { %v441_v5 = vpop.f32.mrb[13].mxu0 }
 0x109   : > { %v1618_v6 = vpop.f32.mrb[14].mxu0 }
 0x10a   : > { %v527_v7 = vpack.c.bf16 %v1618_v6, %v1617_v4  ;;  %v444_v8 = vpop.f32.mrb[15].mxu0  ;;  %v1764_v4 = vld [vmem:[%s2293_s1 + $0xd0] ss:$8 sps:$4 sm:$0xff]   ;;  %v1767_v6 = vld [vmem:[%s2293_s1 + $0xe0] ss:$8 sps:$4 sm:$0xff]  }
 0x10b   : > { %v526_v9 = vpack.c.bf16 %v444_v8, %v441_v5  ;;  %v1765_v5 = vld [vmem:[%s2293_s1 + $0xe4] ss:$8 sps:$4 sm:$0xff]   ;;  %v1770_v8 = vld [vmem:[%s2293_s1 + $0xf0] ss:$8 sps:$4 sm:$0xff]  }
 0x10f   : > { %v1621_v10 = vpop.f32.mrb[16].mxu0 }
 0x110   : > { %v457_v11 = vpop.f32.mrb[17].mxu0 }
 0x111   : > { %v1622_v12 = vpop.f32.mrb[18].mxu0 }
 0x112   : > { %v529_v13 = vpack.c.bf16 %v1622_v12, %v1621_v10  ;;  %v460_v14 = vpop.f32.mrb[19].mxu0  ;;  %v222_v10 = vld [vmem:[%s2294_s2] sm:$0xff] }
 0x113   : > { %v528_v15 = vpack.c.bf16 %v460_v14, %v457_v11  ;;  %v223_v14 = vld [vmem:[%s2294_s2 + $0x8] sm:$0xff] }
 0x115   : > { %1465 = vmatprep.subr.bf16.mxu1 %v528_v15 }
 0x116   : > { %1466 = vmatpush3.bf16.msra.mxu1 %v520_v55  ;;  %v1752_v55 = vld [vmem:[%s2293_s1 + $0x90] ss:$8 sps:$4 sm:$0xff]  }
 0x117   : > { %v1625_v16 = vpop.f32.mrb[20].mxu0  ;;  %1467 = vmatprep.subr.bf16.mxu1 %v529_v13 }
 0x118   : > { %v473_v17 = vpop.f32.mrb[21].mxu0 }
 0x119   : > { %v1626_v18 = vpop.f32.mrb[22].mxu0 }
 0x11a   : > { %v531_v19 = vpack.c.bf16 %v1626_v18, %v1625_v16  ;;  %v476_v20 = vpop.f32.mrb[23].mxu0  ;;  %1468 = vmatpush3.bf16.msra.mxu1 %v521_v53  ;;  %v1749_v53 = vld [vmem:[%s2293_s1 + $0x80] ss:$8 sps:$4 sm:$0xff]  }
 0x11b   : > { %v530_v21 = vpack.c.bf16 %v476_v20, %v473_v17 }
 0x11d   : > { %1469 = vmatprep.subr.bf16.mxu1 %v530_v21 }
 0x11e   : > { %1470 = vmatpush3.bf16.msra.mxu1 %v522_v61  ;;  %v1759_v61 = vld [vmem:[%s2293_s1 + $0xc4] ss:$8 sps:$4 sm:$0xff]  }
 0x11f   : > { %v1629_v22 = vpop.f32.mrb[24].mxu0  ;;  %1471 = vmatprep.subr.bf16.mxu1 %v531_v19 }
 0x120   : > { %v489_v23 = vpop.f32.mrb[25].mxu0 }
 0x121   : > { %v1630_v24 = vpop.f32.mrb[26].mxu0 }
 0x122   : > { %v533_v25 = vpack.c.bf16 %v1630_v24, %v1629_v22  ;;  %v492_v26 = vpop.f32.mrb[27].mxu0  ;;  %1472 = vmatpush3.bf16.msra.mxu1 %v523_v59  ;;  %v1774_v59 = vld [vmem:[%s2293_s1 + $0x140] ss:$8 sps:$4 sm:$0xff]   ;;  %v224_v22 = vld [vmem:[%s2294_s2 + $0x10] sm:$0xff] }
 0x123   : > { %v532_v27 = vpack.c.bf16 %v492_v26, %v489_v23  ;;  %1641 = vmatprep.subr.bf16.mxu0 %v1774_v59 }
 0x124   : > { %1642 = vmatpush3.bf16.msra.mxu0 %v1774_v59 }
 0x125   : > { %1473 = vmatprep.subr.bf16.mxu1 %v532_v27  ;;  %1643 = vmatprep.subr.bf16.mxu0 %v1775_v62  ;;  %v225_v27 = vld [vmem:[%s2294_s2 + $0x18] sm:$0xff] }
 0x126   : > { %1474 = vmatpush3.bf16.msra.mxu1 %v524_v3  ;;  %v1778_v3 = vld [vmem:[%s2293_s1 + $0x180] ss:$8 sps:$4 sm:$0xff]  }
 0x127   : > { %v1633_v28 = vpop.f32.mrb[28].mxu0  ;;  %1475 = vmatprep.subr.bf16.mxu1 %v533_v25 }
 0x128   : > { %v505_v29 = vpop.f32.mrb[29].mxu0  ;;  %1644 = vmatpush3.bf16.msra.mxu0 %v1775_v62 }
 0x129   : > { %v1634_v30 = vpop.f32.mrb[30].mxu0  ;;  %1645 = vmatprep.subr.bf16.mxu0 %v1776_v63 }
 0x12a   : > { %v535_v31 = vpack.c.bf16 %v1634_v30, %v1633_v28  ;;  %v508_v32 = vpop.f32.mrb[31].mxu0  ;;  %1476 = vmatpush3.bf16.msra.mxu1 %v525_v1  ;;  %v1762_v1 = vld [vmem:[%s2293_s1 + $0xd4] ss:$8 sps:$4 sm:$0xff]  }
 0x12b   : > { %v534_v33 = vpack.c.bf16 %v508_v32, %v505_v29 }
 0x12c   : > { %1646 = vmatpush3.bf16.msra.mxu0 %v1776_v63 }
 0x12d   : > { %1477 = vmatprep.subr.bf16.mxu1 %v534_v33  ;;  %1647 = vmatprep.subr.bf16.mxu0 %v1777_v2 }
 0x12e   : > { %1478 = vmatpush3.bf16.msra.mxu1 %v526_v9 }
 0x12f   : > { %1479 = vmatprep.subr.bf16.mxu1 %v535_v31 }
 0x130   : > { %1648 = vmatpush3.bf16.msra.mxu0 %v1777_v2  ;;  %v231_v2 = vld [vmem:[%s2294_s2 + $0x48] sm:$0xff] }
 0x131   : > { %1649 = vmatprep.subr.bf16.mxu0 %v1778_v3 }
 0x132   : > { %1480 = vmatpush3.bf16.msra.mxu1 %v527_v7  ;;  %v1768_v7 = vld [vmem:[%s2293_s1 + $0xf4] ss:$8 sps:$4 sm:$0xff]  }
 0x134   : > { %1650 = vmatpush3.bf16.msra.mxu0 %v1778_v3 }
 0x135   : > { %729 = vmatmul.mubr.bf16.vlgmr.msra.gmra.mrb[0].mxu1 %v1723_v36 }
 0x136   : > { %736 = vmatprep.mubr.bf16.mxu1 %v1726_v38 }
 0x13d   : > { %737 = vmatmul.mubr.bf16.gmra.mrb[4].mxu1 %v1728_v39 }
 0x13e   : > { %744 = vmatprep.mubr.bf16.mxu1 %v1729_v40  ;;  %v227_v40 = vld [vmem:[%s2294_s2 + $0x28] sm:$0xff] }
 0x145   : > { %745 = vmatmul.mubr.bf16.gmra.mrb[8].mxu1 %v1731_v41 }
 0x146   : > { %752 = vmatprep.mubr.bf16.mxu1 %v1732_v42 }
 0x14d   : > { %753 = vmatmul.mubr.bf16.gmra.mrb[12].mxu1 %v1734_v43 }
 0x14e   : > { %760 = vmatprep.mubr.bf16.mxu1 %v1735_v44 }
 0x155   : > { %761 = vmatmul.mubr.bf16.gmra.mrb[16].mxu1 %v1737_v45 }
 0x156   : > { %768 = vmatprep.mubr.bf16.mxu1 %v1738_v46 }
 0x15d   : > { %769 = vmatmul.mubr.bf16.gmra.mrb[20].mxu1 %v1740_v47 }
 0x15e   : > { %776 = vmatprep.mubr.bf16.mxu1 %v1741_v48  ;;  %v228_v48 = vld [vmem:[%s2294_s2 + $0x30] sm:$0xff] }
 0x165   : > { %777 = vmatmul.mubr.bf16.gmra.mrb[24].mxu1 %v1743_v49 }
 0x166   : > { %784 = vmatprep.mubr.bf16.mxu1 %v1744_v50 }
 0x16d   : > { %785 = vmatmul.mubr.bf16.gmra.mrb[28].mxu1 %v1746_v51 }
 0x16e   : > { %792 = vmatprep.mubr.bf16.mxu1 %v1747_v52 }
 0x175   : > { %793 = vmatmul.mubr.bf16.gmra.mrb[32].mxu1 %v1749_v53  ;;  %v229_v53 = vld [vmem:[%s2294_s2 + $0x38] sm:$0xff] }
 0x176   : > { %800 = vmatprep.mubr.bf16.mxu1 %v1750_v54 }
 0x17d   : > { %801 = vmatmul.mubr.bf16.gmra.mrb[36].mxu1 %v1752_v55 }
 0x17e   : > { %808 = vmatprep.mubr.bf16.mxu1 %v1753_v56 }
 0x185   : > { %809 = vmatmul.mubr.bf16.gmra.mrb[40].mxu1 %v1755_v57 }
 0x186   : > { %816 = vmatprep.mubr.bf16.mxu1 %v1756_v58 }
 0x18d   : > { %817 = vmatmul.mubr.bf16.gmra.mrb[44].mxu1 %v1758_v60 }
 0x18e   : > { %824 = vmatprep.mubr.bf16.mxu1 %v1759_v61  ;;  %v230_v61 = vld [vmem:[%s2294_s2 + $0x40] sm:$0xff] }
 0x195   : > { %825 = vmatmul.mubr.bf16.gmra.mrb[48].mxu1 %v1761_v0 }
 0x196   : > { %832 = vmatprep.mubr.bf16.mxu1 %v1762_v1 }
 0x19d   : > { %833 = vmatmul.mubr.bf16.gmra.mrb[52].mxu1 %v1764_v4 }
 0x19e   : > { %840 = vmatprep.mubr.bf16.mxu1 %v1765_v5 }
 0x1a5   : > { %841 = vmatmul.mubr.bf16.gmra.mrb[56].mxu1 %v1767_v6 }
 0x1a6   : > { %848 = vmatprep.mubr.bf16.mxu1 %v1768_v7 }
 0x1ad   : > { %849 = vmatmul.mubr.bf16.gmra.mrb[60].mxu1 %v1770_v8 }
 0x208   : > { %v1481_v9 = vpop.f32.mrb[0].mxu1 }
 0x209   : > { %v1482_v11 = vpop.f32.mrb[1].mxu1 }
 0x20a   : > { %v1483_v12 = vadd.f32 %v1482_v11, %v1481_v9  ;;  %v1484_v13 = vpop.f32.mrb[2].mxu1 }
 0x20b   : > { %v1485_v15 = vpop.f32.mrb[3].mxu1 }
 0x20c   : > { %v731_v16 = vadd.f32 %v1483_v12, %v222_v10  ;;  %v1486_v17 = vadd.f32 %v1485_v15, %v1484_v13  ;;  %v232_v10 = vld [vmem:[%s2294_s2 + $0x50] sm:$0xff]  ;;  %v233_v15 = vld [vmem:[%s2294_s2 + $0x58] sm:$0xff] }
 0x20e   : > { %v734_v18 = vadd.f32 %v1486_v17, %v223_v14  ;;  %v857_v19 = vmax.f32 %v731_v16, 0.0 }
 0x210   : > { %v858_v20 = vmax.f32 %v734_v18, 0.0  ;;  %v1487_v21 = vpop.f32.mrb[4].mxu1 }
 0x211   : > { %v1488_v23 = vpop.f32.mrb[5].mxu1 }
 0x212   : > { %v1489_v24 = vadd.f32 %v1488_v23, %v1487_v21  ;;  %v1490_v25 = vpop.f32.mrb[6].mxu1  ;;  %v889_v26 = vpack.c.bf16 %v858_v20, %v857_v19  ;;  %v234_v23 = vld [vmem:[%s2294_s2 + $0x60] sm:$0xff] }
 0x213   : > { %v1491_v28 = vpop.f32.mrb[7].mxu1 }
 0x214   : > { %v739_v29 = vadd.f32 %v1489_v24, %v224_v22  ;;  %v1492_v30 = vadd.f32 %v1491_v28, %v1490_v25  ;;  %1651 = vmatprep.mubr.bf16.mxu0 %v889_v26  ;;  %v235_v28 = vld [vmem:[%s2294_s2 + $0x68] sm:$0xff] }
 0x216   : > { %v742_v31 = vadd.f32 %v1492_v30, %v225_v27  ;;  %v859_v32 = vmax.f32 %v739_v29, 0.0 }
 0x218   : > { %v860_v33 = vmax.f32 %v742_v31, 0.0  ;;  %v1493_v34 = vpop.f32.mrb[8].mxu1 }
 0x219   : > { %v1494_v36 = vpop.f32.mrb[9].mxu1 }
 0x21a   : > { %v890_v37 = vpack.c.bf16 %v860_v33, %v859_v32  ;;  %v1495_v38 = vadd.f32 %v1494_v36, %v1493_v34  ;;  %v1496_v39 = vpop.f32.mrb[10].mxu1  ;;  %v236_v36 = vld [vmem:[%s2294_s2 + $0x70] sm:$0xff] }
 0x21b   : > { %v1497_v41 = vpop.f32.mrb[11].mxu1 }
 0x21c   : > { %v747_v42 = vadd.f32 %v1495_v38, %v226_v35  ;;  %v1498_v43 = vadd.f32 %v1497_v41, %v1496_v39  ;;  %1652 = vmatmul.mubr.bf16.vlgmr.msra.gmra.mrb[32].mxu0 %v890_v37  ;;  %v237_v41 = vld [vmem:[%s2294_s2 + $0x78] sm:$0xff] }
 0x21e   : > { %v750_v44 = vadd.f32 %v1498_v43, %v227_v40  ;;  %v861_v45 = vmax.f32 %v747_v42, 0.0 }
 0x220   : > { %v862_v46 = vmax.f32 %v750_v44, 0.0  ;;  %v1499_v47 = vpop.f32.mrb[12].mxu1 }
 0x221   : > { %v1500_v49 = vpop.f32.mrb[13].mxu1 }
 0x222   : > { %v1501_v50 = vadd.f32 %v1500_v49, %v1499_v47  ;;  %v1502_v51 = vpop.f32.mrb[14].mxu1  ;;  %v891_v52 = vpack.c.bf16 %v862_v46, %v861_v45  ;;  %v238_v49 = vld [vmem:[%s2294_s2 + $0x80] sm:$0xff] }
 0x223   : > { %v1503_v54 = vpop.f32.mrb[15].mxu1 }
 0x224   : > { %v755_v55 = vadd.f32 %v1501_v50, %v228_v48  ;;  %v1504_v56 = vadd.f32 %v1503_v54, %v1502_v51  ;;  %1655 = vmatprep.mubr.bf16.mxu0 %v891_v52  ;;  %v239_v54 = vld [vmem:[%s2294_s2 + $0x88] sm:$0xff] }
 0x226   : > { %v758_v57 = vadd.f32 %v1504_v56, %v229_v53  ;;  %v863_v58 = vmax.f32 %v755_v55, 0.0 }
 0x228   : > { %v864_v59 = vmax.f32 %v758_v57, 0.0  ;;  %v1505_v60 = vpop.f32.mrb[16].mxu1 }
 0x229   : > { %v1506_v62 = vpop.f32.mrb[17].mxu1 }
 0x22a   : > { %v1507_v63 = vadd.f32 %v1506_v62, %v1505_v60  ;;  %v1508_v0 = vpop.f32.mrb[18].mxu1  ;;  %v892_v1 = vpack.c.bf16 %v864_v59, %v863_v58  ;;  %v240_v62 = vld [vmem:[%s2294_s2 + $0x90] sm:$0xff] }
 0x22b   : > { %v1509_v3 = vpop.f32.mrb[19].mxu1 }
 0x22c   : > { %v763_v4 = vadd.f32 %v1507_v63, %v230_v61  ;;  %v1510_v5 = vadd.f32 %v1509_v3, %v1508_v0  ;;  %1656 = vmatmul.mubr.bf16.gmra.mrb[36].mxu0 %v892_v1  ;;  %v241_v3 = vld [vmem:[%s2294_s2 + $0x98] sm:$0xff] }
 0x22e   : > { %v766_v6 = vadd.f32 %v1510_v5, %v231_v2  ;;  %v865_v7 = vmax.f32 %v763_v4, 0.0 }
 0x230   : > { %v866_v8 = vmax.f32 %v766_v6, 0.0  ;;  %v1511_v9 = vpop.f32.mrb[20].mxu1 }
 0x231   : > { %v1512_v11 = vpop.f32.mrb[21].mxu1 }
 0x232   : > { %v1513_v12 = vadd.f32 %v1512_v11, %v1511_v9  ;;  %v1514_v13 = vpop.f32.mrb[22].mxu1  ;;  %v893_v14 = vpack.c.bf16 %v866_v8, %v865_v7  ;;  %v242_v11 = vld [vmem:[%s2294_s2 + $0xa0] sm:$0xff] }
 0x233   : > { %v1515_v16 = vpop.f32.mrb[23].mxu1 }
 0x234   : > { %v771_v17 = vadd.f32 %v1513_v12, %v232_v10  ;;  %v1516_v18 = vadd.f32 %v1515_v16, %v1514_v13  ;;  %1659 = vmatprep.mubr.bf16.mxu0 %v893_v14  ;;  %v243_v16 = vld [vmem:[%s2294_s2 + $0xa8] sm:$0xff] }
 0x236   : > { %v774_v19 = vadd.f32 %v1516_v18, %v233_v15  ;;  %v867_v20 = vmax.f32 %v771_v17, 0.0 }
 0x238   : > { %v868_v21 = vmax.f32 %v774_v19, 0.0  ;;  %v1517_v22 = vpop.f32.mrb[24].mxu1 }
 0x239   : > { %v1518_v24 = vpop.f32.mrb[25].mxu1 }
 0x23a   : > { %v1519_v25 = vadd.f32 %v1518_v24, %v1517_v22  ;;  %v1520_v26 = vpop.f32.mrb[26].mxu1  ;;  %v894_v27 = vpack.c.bf16 %v868_v21, %v867_v20  ;;  %v244_v24 = vld [vmem:[%s2294_s2 + $0xb0] sm:$0xff] }
 0x23b   : > { %v1521_v29 = vpop.f32.mrb[27].mxu1 }
 0x23c   : > { %v779_v30 = vadd.f32 %v1519_v25, %v234_v23  ;;  %v1522_v31 = vadd.f32 %v1521_v29, %v1520_v26  ;;  %1660 = vmatmul.mubr.bf16.gmra.mrb[40].mxu0 %v894_v27  ;;  %v245_v29 = vld [vmem:[%s2294_s2 + $0xb8] sm:$0xff] }
 0x23e   : > { %v782_v32 = vadd.f32 %v1522_v31, %v235_v28  ;;  %v869_v33 = vmax.f32 %v779_v30, 0.0 }
 0x240   : > { %v870_v34 = vmax.f32 %v782_v32, 0.0  ;;  %v1523_v35 = vpop.f32.mrb[28].mxu1 }
 0x241   : > { %v1524_v37 = vpop.f32.mrb[29].mxu1 }
 0x242   : > { %v1525_v38 = vadd.f32 %v1524_v37, %v1523_v35  ;;  %v1526_v39 = vpop.f32.mrb[30].mxu1  ;;  %v895_v40 = vpack.c.bf16 %v870_v34, %v869_v33  ;;  %v246_v37 = vld [vmem:[%s2294_s2 + $0xc0] sm:$0xff] }
 0x243   : > { %v1527_v42 = vpop.f32.mrb[31].mxu1 }
 0x244   : > { %v787_v43 = vadd.f32 %v1525_v38, %v236_v36  ;;  %v1528_v44 = vadd.f32 %v1527_v42, %v1526_v39  ;;  %1663 = vmatprep.mubr.bf16.mxu0 %v895_v40  ;;  %v247_v42 = vld [vmem:[%s2294_s2 + $0xc8] sm:$0xff] }
 0x246   : > { %v790_v45 = vadd.f32 %v1528_v44, %v237_v41  ;;  %v871_v46 = vmax.f32 %v787_v43, 0.0 }
 0x248   : > { %v872_v47 = vmax.f32 %v790_v45, 0.0  ;;  %v1529_v48 = vpop.f32.mrb[32].mxu1 }
 0x249   : > { %v1530_v50 = vpop.f32.mrb[33].mxu1 }
 0x24a   : > { %v1531_v51 = vadd.f32 %v1530_v50, %v1529_v48  ;;  %v1532_v52 = vpop.f32.mrb[34].mxu1  ;;  %v896_v53 = vpack.c.bf16 %v872_v47, %v871_v46  ;;  %v248_v50 = vld [vmem:[%s2294_s2 + $0xd0] sm:$0xff] }
 0x24b   : > { %v1533_v55 = vpop.f32.mrb[35].mxu1 }
 0x24c   : > { %v795_v56 = vadd.f32 %v1531_v51, %v238_v49  ;;  %v1534_v57 = vadd.f32 %v1533_v55, %v1532_v52  ;;  %1664 = vmatmul.mubr.bf16.gmra.mrb[44].mxu0 %v896_v53  ;;  %v249_v55 = vld [vmem:[%s2294_s2 + $0xd8] sm:$0xff] }
 0x24e   : > { %v798_v58 = vadd.f32 %v1534_v57, %v239_v54  ;;  %v873_v59 = vmax.f32 %v795_v56, 0.0 }
 0x250   : > { %v874_v60 = vmax.f32 %v798_v58, 0.0  ;;  %v1535_v61 = vpop.f32.mrb[36].mxu1 }
 0x251   : > { %v1536_v63 = vpop.f32.mrb[37].mxu1 }
 0x252   : > { %v1537_v0 = vadd.f32 %v1536_v63, %v1535_v61  ;;  %v1538_v1 = vpop.f32.mrb[38].mxu1  ;;  %v897_v2 = vpack.c.bf16 %v874_v60, %v873_v59  ;;  %v250_v63 = vld [vmem:[%s2294_s2 + $0xe0] sm:$0xff] }
 0x253   : > { %v1539_v4 = vpop.f32.mrb[39].mxu1 }
 0x254   : > { %v803_v5 = vadd.f32 %v1537_v0, %v240_v62  ;;  %v1540_v6 = vadd.f32 %v1539_v4, %v1538_v1  ;;  %1667 = vmatprep.mubr.bf16.mxu0 %v897_v2  ;;  %v251_v4 = vld [vmem:[%s2294_s2 + $0xe8] sm:$0xff] }
 0x256   : > { %v806_v7 = vadd.f32 %v1540_v6, %v241_v3  ;;  %v875_v8 = vmax.f32 %v803_v5, 0.0 }
 0x258   : > { %v876_v9 = vmax.f32 %v806_v7, 0.0  ;;  %v1541_v10 = vpop.f32.mrb[40].mxu1 }
 0x259   : > { %v1542_v12 = vpop.f32.mrb[41].mxu1 }
 0x25a   : > { %v1543_v13 = vadd.f32 %v1542_v12, %v1541_v10  ;;  %v1544_v14 = vpop.f32.mrb[42].mxu1  ;;  %v898_v15 = vpack.c.bf16 %v876_v9, %v875_v8  ;;  %v252_v12 = vld [vmem:[%s2294_s2 + $0xf0] sm:$0xff] }
 0x25b   : > { %v1545_v17 = vpop.f32.mrb[43].mxu1 }
 0x25c   : > { %v811_v18 = vadd.f32 %v1543_v13, %v242_v11  ;;  %v1546_v19 = vadd.f32 %v1545_v17, %v1544_v14  ;;  %1668 = vmatmul.mubr.bf16.gmra.mrb[48].mxu0 %v898_v15  ;;  %v253_v17 = vld [vmem:[%s2294_s2 + $0xf8] sm:$0xff] }
 0x25e   : > { %v814_v20 = vadd.f32 %v1546_v19, %v243_v16  ;;  %v877_v21 = vmax.f32 %v811_v18, 0.0 }
 0x260   : > { %v878_v22 = vmax.f32 %v814_v20, 0.0  ;;  %v1547_v23 = vpop.f32.mrb[44].mxu1 }
 0x261   : > { %v1548_v25 = vpop.f32.mrb[45].mxu1 }
 0x262   : > { %v1549_v26 = vadd.f32 %v1548_v25, %v1547_v23  ;;  %v1550_v27 = vpop.f32.mrb[46].mxu1  ;;  %v899_v28 = vpack.c.bf16 %v878_v22, %v877_v21 }
 0x263   : > { %v1551_v30 = vpop.f32.mrb[47].mxu1 }
 0x264   : > { %v819_v31 = vadd.f32 %v1549_v26, %v244_v24  ;;  %v1552_v32 = vadd.f32 %v1551_v30, %v1550_v27  ;;  %1671 = vmatprep.mubr.bf16.mxu0 %v899_v28 }
 0x266   : > { %v822_v33 = vadd.f32 %v1552_v32, %v245_v29  ;;  %v879_v34 = vmax.f32 %v819_v31, 0.0 }
 0x268   : > { %v880_v35 = vmax.f32 %v822_v33, 0.0  ;;  %v1553_v36 = vpop.f32.mrb[48].mxu1 }
 0x269   : > { %v1554_v38 = vpop.f32.mrb[49].mxu1 }
 0x26a   : > { %v1555_v39 = vadd.f32 %v1554_v38, %v1553_v36  ;;  %v1556_v40 = vpop.f32.mrb[50].mxu1  ;;  %v900_v41 = vpack.c.bf16 %v880_v35, %v879_v34  ;;  %v1186_v38 = vlaneseq }
 0x26b   : > { %v1557_v43 = vpop.f32.mrb[51].mxu1 }
 0x26c   : > { %v827_v44 = vadd.f32 %v1555_v39, %v246_v37  ;;  %v1558_v45 = vadd.f32 %v1557_v43, %v1556_v40  ;;  %1672 = vmatmul.mubr.bf16.gmra.mrb[52].mxu0 %v900_v41  ;;  %v1187_v43 = vshrl.u32 %v1186_v38, 7 }
 0x26e   : > { %v830_v46 = vadd.f32 %v1558_v45, %v247_v42  ;;  %v881_v47 = vmax.f32 %v827_v44, 0.0 }
 0x270   : > { %v882_v48 = vmax.f32 %v830_v46, 0.0  ;;  %v1559_v49 = vpop.f32.mrb[52].mxu1 }
 0x271   : > { %v1560_v51 = vpop.f32.mrb[53].mxu1 }
 0x272   : > { %v1561_v52 = vadd.f32 %v1560_v51, %v1559_v49  ;;  %v1562_v53 = vpop.f32.mrb[54].mxu1  ;;  %v901_v54 = vpack.c.bf16 %v882_v48, %v881_v47  ;;  %v1188_v47 = vsub.s32 0, %v1187_v43  ;;  %v254_v48 = vld [vmem:[%s2294_s2 + $0x100] sm:$0xff] }
 0x273   : > { %v1563_v56 = vpop.f32.mrb[55].mxu1 }
 0x274   : > { %v835_v57 = vadd.f32 %v1561_v52, %v248_v50  ;;  %v1564_v58 = vadd.f32 %v1563_v56, %v1562_v53  ;;  %1675 = vmatprep.mubr.bf16.mxu0 %v901_v54  ;;  %v2211_v52 = vrot.slane %v254_v48, %v1188_v47 }
 0x276   : > { %v838_v59 = vadd.f32 %v1564_v58, %v249_v55  ;;  %v883_v60 = vmax.f32 %v835_v57, 0.0 }
 0x278   : > { %v884_v61 = vmax.f32 %v838_v59, 0.0  ;;  %v1565_v62 = vpop.f32.mrb[56].mxu1 }
 0x279   : > { %v1566_v0 = vpop.f32.mrb[57].mxu1 }
 0x27a   : > { %v1567_v1 = vadd.f32 %v1566_v0, %v1565_v62  ;;  %v1568_v2 = vpop.f32.mrb[58].mxu1  ;;  %v902_v3 = vpack.c.bf16 %v884_v61, %v883_v60 }
 0x27b   : > { %v1569_v5 = vpop.f32.mrb[59].mxu1 }
 0x27c   : > { %v843_v6 = vadd.f32 %v1567_v1, %v250_v63  ;;  %v1570_v7 = vadd.f32 %v1569_v5, %v1568_v2  ;;  %1676 = vmatmul.mubr.bf16.gmra.mrb[56].mxu0 %v902_v3  ;;  %v1253_v3 = vsub.s32 1, %v1187_v43  ;;  %v255_v5 = vld [vmem:[%s2294_s2 + $0x108] sm:$0xff] }
 0x27e   : > { %v846_v8 = vadd.f32 %v1570_v7, %v251_v4  ;;  %v885_v9 = vmax.f32 %v843_v6, 0.0 }
 0x280   : > { %v886_v10 = vmax.f32 %v846_v8, 0.0  ;;  %v1571_v11 = vpop.f32.mrb[60].mxu1 }
 0x281   : > { %v1572_v13 = vpop.f32.mrb[61].mxu1 }
 0x282   : > { %v1573_v14 = vadd.f32 %v1572_v13, %v1571_v11  ;;  %v1574_v15 = vpop.f32.mrb[62].mxu1  ;;  %v903_v16 = vpack.c.bf16 %v886_v10, %v885_v9  ;;  %v2218_v10 = vrot.slane %v255_v5, %v1188_v47  ;;  %v2220_v11 = vrot.slane %v255_v5, %v1253_v3 }
 0x283   : > { %v1575_v18 = vpop.f32.mrb[63].mxu1 }
 0x284   : > { %v851_v19 = vadd.f32 %v1573_v14, %v252_v12  ;;  %v1576_v20 = vadd.f32 %v1575_v18, %v1574_v15  ;;  %1679 = vmatprep.mubr.bf16.mxu0 %v903_v16 }
 0x286   : > { %v854_v21 = vadd.f32 %v1576_v20, %v253_v17  ;;  %v887_v22 = vmax.f32 %v851_v19, 0.0 }
 0x288   : > { %v888_v23 = vmax.f32 %v854_v21, 0.0 }
 0x28a   : > { %v904_v24 = vpack.c.bf16 %v888_v23, %v887_v22 }
 0x28c   : > { %1680 = vmatmul.mubr.bf16.gmra.mrb[60].mxu0 %v904_v24 }
 0x2ef   : > { %v1653_v25 = vpop.f32.mrb[32].mxu0 }
 0x2f0   : > { %v987_v26 = vpop.f32.mrb[33].mxu0 }
 0x2f1   : > { %v1654_v27 = vpop.f32.mrb[34].mxu0 }
 0x2f2   : > { %v990_v28 = vpop.f32.mrb[35].mxu0 }
 0x2f3   : > { %v1114_v29 = vadd.f32 %v990_v28, %v987_v26 }
 0x2f5   : > { %v1115_v30 = vadd.f32 %v1653_v25, %v1114_v29 }
 0x2f7   : > { %v1116_v31 = vadd.f32 %v1654_v27, %v1115_v30 }
 0x2f9   : > { %v1117_v32 = vrot.slane %v1116_v31, 4 }
 0x2fb   : > { %v1118_v33 = vadd.f32 %v1117_v32, %v1116_v31 }
 0x2fd   : > { %v1119_v37 = vrot.slane %v1118_v33, 2 }
 0x2ff   : > { %v1657_v34 = vpop.f32.mrb[36].mxu0  ;;  %v1120_v42 = vadd.f32 %v1119_v37, %v1118_v33 }
 0x300   : > { %v1003_v35 = vpop.f32.mrb[37].mxu0 }
 0x301   : > { %v1658_v36 = vpop.f32.mrb[38].mxu0  ;;  %v1121_v46 = vrot.slane %v1120_v42, 1 }
 0x302   : > { %v1006_v39 = vpop.f32.mrb[39].mxu0 }
 0x303   : > { %v1123_v40 = vadd.f32 %v1006_v39, %v1003_v35  ;;  %v1122_v51 = vadd.f32 %v1121_v46, %v1120_v42 }
 0x305   : > { %v1124_v41 = vadd.f32 %v1657_v34, %v1123_v40  ;;  %v1190_v58 = vadd.f32 %v2211_v52, %v1122_v51 }
 0x307   : > { %v1125_v44 = vadd.f32 %v1658_v36, %v1124_v41  ;;  %1779 = vtanh.f32 %v1190_v58 }
 0x309   : > { %v1126_v45 = vrot.slane %v1125_v44, 4 }
 0x30b   : > { %v1127_v49 = vadd.f32 %v1126_v45, %v1125_v44 }
 0x30d   : > { %v1128_v50 = vrot.slane %v1127_v49, 2 }
 0x30f   : > { %v1129_v53 = vadd.f32 %v1128_v50, %v1127_v49  ;;  %v1661_v54 = vpop.f32.mrb[40].mxu0 }
 0x310   : > { %v1019_v55 = vpop.f32.mrb[41].mxu0 }
 0x311   : > { %v1130_v56 = vrot.slane %v1129_v53, 1  ;;  %v1662_v57 = vpop.f32.mrb[42].mxu0  ;;  %v1780_v8 = vpop.eup %1779 }
 0x312   : > { %v1022_v59 = vpop.f32.mrb[43].mxu0  ;;  %v1210_v20 = vmul.f32 %v1780_v8, %v2218_v10  ;;  %v1255_v22 = vmul.f32 %v1780_v8, %v2220_v11 }
 0x313   : > { %v1131_v60 = vadd.f32 %v1130_v56, %v1129_v53  ;;  %v1132_v61 = vadd.f32 %v1022_v59, %v1019_v55 }
 0x315   : > { %v1191_v62 = vadd.f32 %v2211_v52, %v1131_v60  ;;  %v1133_v63 = vadd.f32 %v1661_v54, %v1132_v61 }
 0x317   : > { %1781 = vtanh.f32 %v1191_v62  ;;  %v1134_v0 = vadd.f32 %v1662_v57, %v1133_v63 }
 0x319   : > { %v1135_v1 = vrot.slane %v1134_v0, 4 }
 0x31b   : > { %v1136_v2 = vadd.f32 %v1135_v1, %v1134_v0 }
 0x31d   : > { %v1137_v4 = vrot.slane %v1136_v2, 2 }
 0x31f   : > { %v1138_v6 = vadd.f32 %v1137_v4, %v1136_v2  ;;  %v1665_v7 = vpop.f32.mrb[44].mxu0 }
 0x320   : > { %v1035_v9 = vpop.f32.mrb[45].mxu0 }
 0x321   : > { %v1782_v12 = vpop.eup %1781  ;;  %v1139_v13 = vrot.slane %v1138_v6, 1  ;;  %v1666_v14 = vpop.f32.mrb[46].mxu0 }
 0x322   : > { %v1038_v15 = vpop.f32.mrb[47].mxu0  ;;  %v1211_v16 = vmul.f32 %v1782_v12, %v2218_v10  ;;  %v1256_v17 = vmul.f32 %v1782_v12, %v2220_v11 }
 0x323   : > { %v1140_v18 = vadd.f32 %v1139_v13, %v1138_v6  ;;  %v1141_v19 = vadd.f32 %v1038_v15, %v1035_v9 }
 0x324   : > { %v1226_v21 = vrot.slane %v1211_v16, 7  ;;  %v1271_v23 = vrot.slane %v1256_v17, 7 }
 0x325   : > { %v1192_v24 = vadd.f32 %v2211_v52, %v1140_v18  ;;  %v1142_v25 = vadd.f32 %v1665_v7, %v1141_v19 }
 0x326   : > { %v1228_v26 = vsel %vm1227_vm1, %v1226_v21, %v1210_v20  ;;  %v1272_v27 = vsel %vm1227_vm1, %v1271_v23, %v1255_v22 }
 0x327   : > { %1783 = vtanh.f32 %v1192_v24  ;;  %v1143_v28 = vadd.f32 %v1666_v14, %v1142_v25 }
 0x329   : > { %v1144_v29 = vrot.slane %v1143_v28, 4 }
 0x32b   : > { %v1145_v30 = vadd.f32 %v1144_v29, %v1143_v28 }
 0x32d   : > { %v1146_v31 = vrot.slane %v1145_v30, 2 }
 0x32f   : > { %v1147_v32 = vadd.f32 %v1146_v31, %v1145_v30  ;;  %v1669_v33 = vpop.f32.mrb[48].mxu0 }
 0x330   : > { %v1051_v34 = vpop.f32.mrb[49].mxu0 }
 0x331   : > { %v1784_v35 = vpop.eup %1783  ;;  %v1148_v36 = vrot.slane %v1147_v32, 1  ;;  %v1670_v37 = vpop.f32.mrb[50].mxu0 }
 0x332   : > { %v1054_v39 = vpop.f32.mrb[51].mxu0  ;;  %v1212_v40 = vmul.f32 %v1784_v35, %v2218_v10  ;;  %v1257_v41 = vmul.f32 %v1784_v35, %v2220_v11 }
 0x333   : > { %v1149_v42 = vadd.f32 %v1148_v36, %v1147_v32  ;;  %v1150_v43 = vadd.f32 %v1054_v39, %v1051_v34 }
 0x334   : > { %v1229_v44 = vrot.slane %v1212_v40, 6  ;;  %v1273_v45 = vrot.slane %v1257_v41, 6 }
 0x335   : > { %v1193_v46 = vadd.f32 %v2211_v52, %v1149_v42  ;;  %v1151_v47 = vadd.f32 %v1669_v33, %v1150_v43 }
 0x336   : > { %v1231_v48 = vsel %vm1230_vm2, %v1229_v44, %v1228_v26  ;;  %v1274_v49 = vsel %vm1230_vm2, %v1273_v45, %v1272_v27 }
 0x337   : > { %1785 = vtanh.f32 %v1193_v46  ;;  %v1152_v50 = vadd.f32 %v1670_v37, %v1151_v47 }
 0x339   : > { %v1153_v51 = vrot.slane %v1152_v50, 4 }
 0x33b   : > { %v1154_v53 = vadd.f32 %v1153_v51, %v1152_v50 }
 0x33d   : > { %v1155_v54 = vrot.slane %v1154_v53, 2 }
 0x33f   : > { %v1156_v55 = vadd.f32 %v1155_v54, %v1154_v53  ;;  %v1673_v56 = vpop.f32.mrb[52].mxu0 }
 0x340   : > { %v1067_v57 = vpop.f32.mrb[53].mxu0 }
 0x341   : > { %v1786_v58 = vpop.eup %1785  ;;  %v1157_v59 = vrot.slane %v1156_v55, 1  ;;  %v1674_v60 = vpop.f32.mrb[54].mxu0 }
 0x342   : > { %v1070_v61 = vpop.f32.mrb[55].mxu0  ;;  %v1213_v62 = vmul.f32 %v1786_v58, %v2218_v10  ;;  %v1258_v63 = vmul.f32 %v1786_v58, %v2220_v11 }
 0x343   : > { %v1158_v0 = vadd.f32 %v1157_v59, %v1156_v55  ;;  %v1159_v1 = vadd.f32 %v1070_v61, %v1067_v57 }
 0x344   : > { %v1232_v2 = vrot.slane %v1213_v62, 5  ;;  %v1275_v3 = vrot.slane %v1258_v63, 5 }
 0x345   : > { %v1194_v4 = vadd.f32 %v2211_v52, %v1158_v0  ;;  %v1160_v5 = vadd.f32 %v1673_v56, %v1159_v1 }
 0x346   : > { %v1234_v6 = vsel %vm1233_vm3, %v1232_v2, %v1231_v48  ;;  %v1276_v7 = vsel %vm1233_vm3, %v1275_v3, %v1274_v49 }
 0x347   : > { %1787 = vtanh.f32 %v1194_v4  ;;  %v1161_v8 = vadd.f32 %v1674_v60, %v1160_v5 }
 0x349   : > { %v1162_v9 = vrot.slane %v1161_v8, 4 }
 0x34b   : > { %v1163_v12 = vadd.f32 %v1162_v9, %v1161_v8 }
 0x34d   : > { %v1164_v13 = vrot.slane %v1163_v12, 2 }
 0x34f   : > { %v1165_v14 = vadd.f32 %v1164_v13, %v1163_v12  ;;  %v1677_v15 = vpop.f32.mrb[56].mxu0 }
 0x350   : > { %v1083_v16 = vpop.f32.mrb[57].mxu0 }
 0x351   : > { %v1788_v17 = vpop.eup %1787  ;;  %v1166_v18 = vrot.slane %v1165_v14, 1  ;;  %v1678_v19 = vpop.f32.mrb[58].mxu0 }
 0x352   : > { %v1086_v20 = vpop.f32.mrb[59].mxu0  ;;  %v1214_v21 = vmul.f32 %v1788_v17, %v2218_v10  ;;  %v1259_v22 = vmul.f32 %v1788_v17, %v2220_v11 }
 0x353   : > { %v1167_v23 = vadd.f32 %v1166_v18, %v1165_v14  ;;  %v1168_v24 = vadd.f32 %v1086_v20, %v1083_v16 }
 0x354   : > { %v1235_v25 = vrot.slane %v1214_v21, 4  ;;  %v1277_v26 = vrot.slane %v1259_v22, 4 }
 0x355   : > { %v1195_v27 = vadd.f32 %v2211_v52, %v1167_v23  ;;  %v1169_v28 = vadd.f32 %v1677_v15, %v1168_v24  ;;  %v1301_v23 = vand.u32 127, %v1186_v38 }
 0x356   : > { %v1237_v29 = vsel %vm1236_vm4, %v1235_v25, %v1234_v6  ;;  %v1278_v30 = vsel %vm1236_vm4, %v1277_v26, %v1276_v7 }
 0x357   : > { %1789 = vtanh.f32 %v1195_v27  ;;  %v1170_v31 = vadd.f32 %v1678_v19, %v1169_v28  ;;  %vm1303_vm8 = vcmp.eq.s32.totalorder %v1301_v23, 1  ;;  %vm1302_vm9 = vcmp.eq.s32.totalorder %v1301_v23, 0 }
 0x359   : > { %v1171_v32 = vrot.slane %v1170_v31, 4 }
 0x35b   : > { %v1172_v33 = vadd.f32 %v1171_v32, %v1170_v31 }
 0x35d   : > { %v1173_v34 = vrot.slane %v1172_v33, 2 }
 0x35f   : > { %v1174_v35 = vadd.f32 %v1173_v34, %v1172_v33  ;;  %v1681_v36 = vpop.f32.mrb[60].mxu0 }
 0x360   : > { %v1099_v37 = vpop.f32.mrb[61].mxu0 }
 0x361   : > { %v1790_v39 = vpop.eup %1789  ;;  %v1175_v40 = vrot.slane %v1174_v35, 1  ;;  %v1682_v41 = vpop.f32.mrb[62].mxu0 }
 0x362   : > { %v1102_v42 = vpop.f32.mrb[63].mxu0  ;;  %v1215_v43 = vmul.f32 %v1790_v39, %v2218_v10  ;;  %v1260_v44 = vmul.f32 %v1790_v39, %v2220_v11 }
 0x363   : > { %v1176_v45 = vadd.f32 %v1175_v40, %v1174_v35  ;;  %v1177_v46 = vadd.f32 %v1102_v42, %v1099_v37 }
 0x364   : > { %v1238_v47 = vrot.slane %v1215_v43, 3  ;;  %v1279_v48 = vrot.slane %v1260_v44, 3 }
 0x365   : > { %v1196_v49 = vadd.f32 %v2211_v52, %v1176_v45  ;;  %v1178_v50 = vadd.f32 %v1681_v36, %v1177_v46 }
 0x366   : > { %v1240_v51 = vsel %vm1239_vm5, %v1238_v47, %v1237_v29  ;;  %v1280_v53 = vsel %vm1239_vm5, %v1279_v48, %v1278_v30 }
 0x367   : > { %1791 = vtanh.f32 %v1196_v49  ;;  %v1179_v54 = vadd.f32 %v1682_v41, %v1178_v50 }
 0x369   : > { %v1180_v55 = vrot.slane %v1179_v54, 4 }
 0x36b   : > { %v1181_v56 = vadd.f32 %v1180_v55, %v1179_v54 }
 0x36d   : > { %v1182_v57 = vrot.slane %v1181_v56, 2 }
 0x36f   : > { %v1183_v58 = vadd.f32 %v1182_v57, %v1181_v56 }
 0x371   : > { %v1792_v59 = vpop.eup %1791  ;;  %v1184_v60 = vrot.slane %v1183_v58, 1 }
 0x372   : > { %v1216_v61 = vmul.f32 %v1792_v59, %v2218_v10  ;;  %v1261_v62 = vmul.f32 %v1792_v59, %v2220_v11 }
 0x373   : > { %v1185_v63 = vadd.f32 %v1184_v60, %v1183_v58 }
 0x374   : > { %v1241_v0 = vrot.slane %v1216_v61, 2  ;;  %v1281_v1 = vrot.slane %v1261_v62, 2 }
 0x375   : > { %v1197_v2 = vadd.f32 %v2211_v52, %v1185_v63 }
 0x376   : > { %v1243_v3 = vsel %vm1242_vm6, %v1241_v0, %v1240_v51  ;;  %v1282_v4 = vsel %vm1242_vm6, %v1281_v1, %v1280_v53 }
 0x377   : > { %1793 = vtanh.f32 %v1197_v2 }
 0x381   : > { %v1794_v5 = vpop.eup %1793 }
 0x382   : > { %v1217_v6 = vmul.f32 %v1794_v5, %v2218_v10  ;;  %v1262_v7 = vmul.f32 %v1794_v5, %v2220_v11 }
 0x384   : > { %v1244_v8 = vrot.slane %v1217_v6, 1  ;;  %v1283_v9 = vrot.slane %v1262_v7, 1 }
 0x386   : > { %v1246_v12 = vsel %vm1245_vm7, %v1244_v8, %v1243_v3  ;;  %v1284_v13 = vsel %vm1245_vm7, %v1283_v9, %v1282_v4 }
 0x387   : > { %1248 = vadd.xlane.f32.xlu0 %v1246_v12 }
 0x38b   : > { %1286 = vadd.xlane.f32.xlu0 %v1284_v13 }
 0x414   : > { %v1249_v14 = vpop.xlane.xlu0 %1248 }
 0x415   : > { %v1250_v16 = vadd.f32 -0.18039037, %v1249_v14 }
 0x418   : > { %v1287_v15 = vpop.xlane.xlu0 %1286 }
 0x419   : > { %v1288_v52 = vadd.f32 -0.20049499, %v1287_v15 }
 0x41b   : > { %v1289_v17 = vmax.f32 %v1250_v16, %v1288_v52 }
 0x41d   : > { %v1290_v18 = vsub.f32 %v1250_v16, %v1289_v17  ;;  %v1293_v19 = vsub.f32 %v1288_v52, %v1289_v17 }
 0x41f   : > { %v1291_v20 = vmul.f32 1.442695, %v1290_v18  ;;  %v1294_v10 = vmul.f32 1.442695, %v1293_v19 }
 0x421   : > { %1795 = vpow2.f32 %v1291_v20 }
 0x422   : > { %1797 = vpow2.f32 %v1294_v10 }
 0x42b   : > { %v1796_v11 = vpop.eup %1795 }
 0x42c   : > { %v1798_v21 = vpop.eup %1797 }
 0x42d   : > { %v1296_v22 = vadd.f32 %v1798_v21, %v1796_v11 }
 0x42f   : > { %1799 = vrcp.f32 %v1296_v22 }
 0x439   : > { %v1800_v24 = vpop.eup %1799 }
 0x43a   : > { %v1298_v25 = vmul.f32 %v1800_v24, %v1796_v11  ;;  %v1299_v26 = vmul.f32 %v1800_v24, %v1798_v21 }
 0x43c   : > { %v1304_v27 = vsel %vm1303_vm8, %v1299_v26, 0.0 }
 0x43d   : > { %v1305_v38 = vsel %vm1302_vm9, %v1298_v25, %v1304_v27 }
 0x43e   : > { %1306 = vst [vmem:[%s164_s11] sm:$0xff] %v1305_v38 }
 0x43f   : > { %1814 = shalt.err (!%p1811_p3)
}
 0x440   : > { %s1815_s29 = scalar_lea.hbm %s2250_s24, 128  ;;  %s1819_s5 = scalar_lea.hbm %s2295_s3, 512 }
 0x441   : > { %p1816_p4 = scmp.ne.s32.totalorder %s2250_s24, %s1815_s29  ;;  %p1820_p9 = scmp.lt.u32.totalorder %s2250_s24, %s2295_s3 }
 0x442   : > { %p1821_p10 = scmp.lt.u32.totalorder %s1819_s5, %s1815_s29  ;;  %p1823_p12 = scmp.lt.u32.totalorder %s1815_s29, %s2250_s24 }
 0x443   : > { %p1817_p7 = pnand %p1816_p4, %p1924_p5 }
 0x444   : > { %p1822_p11 = por %p1821_p10, %p1820_p9 }
 0x445   : > { %p1818_p8 = pneg %p1817_p7 }
 0x446   : > { %p1824_p13 = por %p1823_p12, %p1822_p11 }
 0x448   : > { %p1825_p0 = pnand %p1824_p13, %p1818_p8 }
 0x44a   : > { %1828 = shalt.err (!%p1825_p0)
}
 0x44b   : > { %1683 = dma.vmem_to_hbm [thread:$0]  (%p1924_p5), %s2252_s17, 128, %s2250_s24, %s1308_s25  }
 0x44c PF: > { %p1689_p1 = scmp.ge.s32.totalorder %s1863_s15, 2  ;;  %s1333_s8 = sand.u32 1, %s1851_s12  }
 0x44d   : > { %s1334_s9 = scalar_lea.sflag [#allocation3], %s1333_s8 }
 0x44e   : > { %p1686_p2 = pnand %p1689_p1, %p1928_p6 }
 0x450   : > { %1846 = dma.done.wait (!%p1686_p2), %s1334_s9, 128  }
 0x451   : > { %1848 = vsyncadd (!%p1686_p2), %s1334_s9, 4294967168  ;;  %p13_p3 = scmp.ge.s32.totalorder %s1911_s18, 6   ;;  %s2298_s12 = smov %s1855_s13 }
 0x452   : > { %s2299_s13 = smov %s1859_s14  ;;  %s2300_s14 = smov %s1922_s21 }
 0x453   : > { %s2301_s15 = smov %s1911_s18  ;;  %15 = sbr.rel (!%p13_p3) target bundleno = 3 (0x3), region = 67 }
 0x45a   :  { %1339 = vsyncpa [#allocation3], 1 }
 0x45b   :  { %1341 = vsyncpa [#allocation3 + $0x1], 1 }

</bundles_post_ra>
